<compile_context>
chip_gen: v6e
topology: v6e:2x2x1
jax: 0.10.0
libtpu: 0.0.40
codegen_flags: <defaults>
</compile_context>

<pallas_src>
import functools

import jax
import jax.numpy as jnp
from jax.experimental import pallas as pl
from jax.experimental.pallas import tpu as pltpu

# -------- hyperparameters (stand-in for `tp`) --------
VOCAB1, VOCAB2 = 32, 40
EMB1_DIM, EMB2_DIM = 16, 16
EMB_DIM = EMB1_DIM + EMB2_DIM          # tp.embedding_dim (after concat)
HIDDEN = 32                            # tp.hidden_size
FILTER = 16                            # tp.filter_size
KERNEL_SIZES = (2, 3, 4)               # tp.kernel_size_list
MAX_SEQ_LEN = 16                       # tp.max_seq_len
LABEL_SIZE = 8                         # tp.label_size
BN_EPS = 1e-5
FTOT = FILTER * len(KERNEL_SIZES)      # fused conv-branch width (48)
KMAX = max(KERNEL_SIZES)


def _vmem():
    return pl.BlockSpec(memory_space=pltpu.MemorySpace.VMEM)


# ---------------- fused Pallas kernel ----------------

def _textcnn_kernel(tok_ref, wrd_ref, w1_ref, w2_ref, shift_ref,
                    cw_ref, cb_ref, fcw_ref, fcb_ref, o_ref,
                    *, batch, seq_len, pool_lens):
    BL = batch * seq_len
    V1, H = w1_ref.shape
    V2 = w2_ref.shape[0]
    FT = cw_ref.shape[2]
    kmax = cw_ref.shape[0]

    # ---- embedding gather (one-hot @ pre-folded tables) + Linear + BN + ReLU ----
    oh1 = (jax.lax.broadcasted_iota(jnp.int32, (BL, V1), 1)
           == tok_ref[...]).astype(jnp.float32)
    oh2 = (jax.lax.broadcasted_iota(jnp.int32, (BL, V2), 1)
           == wrd_ref[...]).astype(jnp.float32)
    h = jnp.dot(oh1, w1_ref[...], preferred_element_type=jnp.float32)
    h = h + jnp.dot(oh2, w2_ref[...], preferred_element_type=jnp.float32)
    h = jnp.maximum(h + shift_ref[...], 0.0)                        # (BL, H)

    # ---- merged Conv1d taps: kmax wide matmuls over sublane-rolled h ----
    acc = jnp.dot(h, cw_ref[0], preferred_element_type=jnp.float32)
    for j in range(1, kmax):                                        # static unroll
        hj = pltpu.roll(h, BL - j, axis=0)                          # hj[r] = h[(r+j)%BL]
        acc = acc + jnp.dot(hj, cw_ref[j], preferred_element_type=jnp.float32)
    acc = jnp.maximum(acc + cb_ref[...], 0.0)                       # (BL, FT) conv+ReLU

    # ---- per-branch masked max-pool (exactly one pooling window per branch) ----
    acc3 = acc.reshape(batch, seq_len, FT)
    l_idx = jax.lax.broadcasted_iota(jnp.int32, (seq_len, FT), 0)   # (L, FT)
    thr = jnp.concatenate(
        [jnp.full((1, FILTER), p, jnp.int32) for p in pool_lens], axis=1)
    mask = (l_idx < thr).reshape(1, seq_len, FT)
    feat = jnp.max(jnp.where(mask, acc3, 0.0), axis=1)              # (batch, FT)

    # ---- classifier (dropout is identity at inference) ----
    o_ref[...] = jnp.dot(feat, fcw_ref[...],
                         preferred_element_type=jnp.float32) + fcb_ref[...]


# ---------------- parameters (deterministic synthetic init) ----------------

def init_params(key):
    ks = jax.random.split(key, 12)
    p = {}
    p["emb1"] = jax.random.normal(ks[0], (VOCAB1, EMB1_DIM), jnp.float32) * 0.1
    p["emb2"] = jax.random.normal(ks[1], (VOCAB2, EMB2_DIM), jnp.float32) * 0.1
    p["proj_w"] = jax.random.normal(ks[2], (EMB_DIM, HIDDEN), jnp.float32) * 0.1
    p["proj_b"] = jax.random.normal(ks[3], (HIDDEN,), jnp.float32) * 0.1
    # BatchNorm1d (eval mode: running stats)
    p["bn_gamma"] = jnp.ones((HIDDEN,), jnp.float32)
    p["bn_beta"] = jnp.zeros((HIDDEN,), jnp.float32)
    p["bn_mean"] = jnp.zeros((HIDDEN,), jnp.float32)
    p["bn_var"] = jnp.ones((HIDDEN,), jnp.float32)
    convs = []
    for i, k in enumerate(KERNEL_SIZES):
        cw = jax.random.normal(ks[4 + i], (k, HIDDEN, FILTER), jnp.float32) * 0.1
        cb = jax.random.normal(ks[7 + i], (FILTER,), jnp.float32) * 0.1
        convs.append((cw, cb))
    p["convs"] = convs
    p["fc_w"] = jax.random.normal(
        ks[10], (FILTER * len(KERNEL_SIZES), LABEL_SIZE), jnp.float32) * 0.1
    p["fc_b"] = jax.random.normal(ks[11], (LABEL_SIZE,), jnp.float32) * 0.1
    return p


# ---------------- forward ----------------

def forward(params, token_ids, word_ids):
    B, L = token_ids.shape
    assert L == MAX_SEQ_LEN

    # Single-pooling-window assumption (matches PyTorch MaxPool1d(L-2k+2) here).
    for k in KERNEL_SIZES:
        conv_len, pool = L - k + 1, L - 2 * k + 2
        assert pool <= conv_len < 2 * pool, (
            "fused max-pool assumes exactly one pooling window per branch")

    # Fold embeddings + Linear + eval-mode BatchNorm1d into pre-scaled tables.
    bn_scale = params["bn_gamma"] * jax.lax.rsqrt(params["bn_var"] + BN_EPS)
    bn_shift = params["bn_beta"] - params["bn_mean"] * bn_scale
    w1 = (params["emb1"] @ params["proj_w"][:EMB1_DIM]) * bn_scale       # (V1, H)
    w2 = (params["emb2"] @ params["proj_w"][EMB1_DIM:]) * bn_scale       # (V2, H)
    shift = (params["proj_b"] * bn_scale + bn_shift).reshape(1, HIDDEN)

    # Merge the three conv branches into one zero-padded weight stack.
    cw = jnp.zeros((KMAX, HIDDEN, FTOT), jnp.float32)
    cbs = []
    for m, (k, (w, b)) in enumerate(zip(KERNEL_SIZES, params["convs"])):
        cw = cw.at[:k, :, m * FILTER:(m + 1) * FILTER].set(w)
        cbs.append(b)
    cb = jnp.concatenate(cbs).reshape(1, FTOT)

    pool_lens = tuple(L - 2 * k + 2 for k in KERNEL_SIZES)
    kernel = functools.partial(_textcnn_kernel, batch=B, seq_len=L,
                               pool_lens=pool_lens)

    # TODO(synk): dropout / spatial_dropout are identity in eval mode; the
    #             training-time stochastic masks are not implemented.
    return pl.pallas_call(
        kernel,
        out_shape=jax.ShapeDtypeStruct((B, LABEL_SIZE), jnp.float32),
        in_specs=[_vmem()] * 9,
        out_specs=_vmem(),
    )(token_ids.reshape(B * L, 1).astype(jnp.int32),
      word_ids.reshape(B * L, 1).astype(jnp.int32),
      w1, w2, shift, cw, cb,
      params["fc_w"], params["fc_b"].reshape(1, LABEL_SIZE))


def forward_ref(params, token_ids, word_ids):
    # pure-jnp reference mirroring the PyTorch module (eval mode)
    x1 = jnp.take(params["emb1"], token_ids, axis=0)
    x2 = jnp.take(params["emb2"], word_ids, axis=0)
    x = jnp.concatenate([x1, x2], axis=-1)
    B, L, D = x.shape
    z = x.reshape(B * L, D) @ params["proj_w"] + params["proj_b"]
    scale = params["bn_gamma"] / jnp.sqrt(params["bn_var"] + BN_EPS)
    z = (z - params["bn_mean"]) * scale + params["bn_beta"]
    h = jnp.maximum(z, 0.0).reshape(B, L, HIDDEN)
    feats = []
    for k, (cw, cb) in zip(KERNEL_SIZES, params["convs"]):
        conv_len = L - k + 1
        pool_len = L - 2 * k + 2
        out = jnp.zeros((B, conv_len, FILTER), jnp.float32)
        for j in range(k):
            out = out + jnp.einsum("blh,hf->blf", h[:, j:j + conv_len, :], cw[j])
        out = jnp.maximum(out + cb, 0.0)
        feats.append(jnp.max(out[:, :pool_len, :], axis=1))
    feat = jnp.concatenate(feats, axis=1)
    return feat @ params["fc_w"] + params["fc_b"]


if __name__ == "__main__":
    key = jax.random.PRNGKey(0)
    pkey, tkey, wkey = jax.random.split(key, 3)
    params = init_params(pkey)

    B = 2
    token_ids = jax.random.randint(tkey, (B, MAX_SEQ_LEN), 0, VOCAB1)
    word_ids = jax.random.randint(wkey, (B, MAX_SEQ_LEN), 0, VOCAB2)

    fwd = jax.jit(forward)
    logits = jax.block_until_ready(fwd(params, token_ids, word_ids))
    ref = forward_ref(params, token_ids, word_ids)

    assert logits.shape == (B, LABEL_SIZE), logits.shape
    assert jnp.allclose(logits, ref, atol=1e-4, rtol=1e-4), "mismatch vs reference"
    print("KERNEL_OK")
</pallas_src>

<mosaic_0001>
module attributes {stable_mosaic.version = 11 : i64} {
  func.func @_textcnn_kernel(%arg0: memref<32x1xi32, #tpu.memory_space<vmem>>, %arg1: memref<32x1xi32, #tpu.memory_space<vmem>>, %arg2: memref<32x32xf32, #tpu.memory_space<vmem>>, %arg3: memref<40x32xf32, #tpu.memory_space<vmem>>, %arg4: memref<1x32xf32, #tpu.memory_space<vmem>>, %arg5: memref<4x32x48xf32, #tpu.memory_space<vmem>>, %arg6: memref<1x48xf32, #tpu.memory_space<vmem>>, %arg7: memref<48x8xf32, #tpu.memory_space<vmem>>, %arg8: memref<1x8xf32, #tpu.memory_space<vmem>>, %arg9: memref<2x8xf32, #tpu.memory_space<vmem>>) attributes {dimension_semantics = [], scalar_prefetch = 0 : i64, scratch_operands = 0 : i64, tpu.core_type = #tpu.core_type<tc>} {
    %0 = tpu.iota {dimensions = array<i32: 1>} : vector<32x32xi32>
    %c0 = arith.constant 0 : index
    %c0_0 = arith.constant 0 : index
    %1 = vector.load %arg0[%c0, %c0_0] : memref<32x1xi32, #tpu.memory_space<vmem>>, vector<32x1xi32>
    %2 = vector.broadcast %1 : vector<32x1xi32> to vector<32x32xi32>
    %3 = arith.cmpi eq, %0, %2 : vector<32x32xi32>
    %4 = arith.extui %3 : vector<32x32xi1> to vector<32x32xi32>
    %5 = arith.sitofp %4 : vector<32x32xi32> to vector<32x32xf32>
    %6 = tpu.iota {dimensions = array<i32: 1>} : vector<32x40xi32>
    %c0_1 = arith.constant 0 : index
    %c0_2 = arith.constant 0 : index
    %7 = vector.load %arg1[%c0_1, %c0_2] : memref<32x1xi32, #tpu.memory_space<vmem>>, vector<32x1xi32>
    %8 = vector.broadcast %7 : vector<32x1xi32> to vector<32x40xi32>
    %9 = arith.cmpi eq, %6, %8 : vector<32x40xi32>
    %10 = arith.extui %9 : vector<32x40xi1> to vector<32x40xi32>
    %11 = arith.sitofp %10 : vector<32x40xi32> to vector<32x40xf32>
    %c0_3 = arith.constant 0 : index
    %c0_4 = arith.constant 0 : index
    %12 = vector.load %arg2[%c0_3, %c0_4] : memref<32x32xf32, #tpu.memory_space<vmem>>, vector<32x32xf32>
    %cst = arith.constant dense<0.000000e+00> : vector<32x32xf32>
    %13 = tpu.matmul %5, %12, %cst {dimension_numbers = #tpu.dot_dimension_numbers<[1], [0], [0], [1], [0, 0, 1, 1], [], []>} : vector<32x32xf32>, vector<32x32xf32>, vector<32x32xf32> -> vector<32x32xf32>
    %c0_5 = arith.constant 0 : index
    %c0_6 = arith.constant 0 : index
    %14 = vector.load %arg3[%c0_5, %c0_6] : memref<40x32xf32, #tpu.memory_space<vmem>>, vector<40x32xf32>
    %cst_7 = arith.constant dense<0.000000e+00> : vector<32x32xf32>
    %15 = tpu.matmul %11, %14, %cst_7 {dimension_numbers = #tpu.dot_dimension_numbers<[1], [0], [0], [1], [0, 0, 1, 1], [], []>} : vector<32x40xf32>, vector<40x32xf32>, vector<32x32xf32> -> vector<32x32xf32>
    %16 = arith.addf %13, %15 : vector<32x32xf32>
    %c0_8 = arith.constant 0 : index
    %c0_9 = arith.constant 0 : index
    %17 = vector.load %arg4[%c0_8, %c0_9] : memref<1x32xf32, #tpu.memory_space<vmem>>, vector<1x32xf32>
    %18 = vector.broadcast %17 : vector<1x32xf32> to vector<32x32xf32>
    %19 = arith.addf %16, %18 : vector<32x32xf32>
    %cst_10 = arith.constant 0.000000e+00 : f32
    %20 = vector.broadcast %cst_10 : f32 to vector<32x32xf32>
    %21 = arith.maximumf %19, %20 : vector<32x32xf32>
    %c0_11 = arith.constant 0 : index
    %c0_12 = arith.constant 0 : index
    %c0_13 = arith.constant 0 : index
    %22 = vector.load %arg5[%c0_11, %c0_12, %c0_13] : memref<4x32x48xf32, #tpu.memory_space<vmem>>, vector<1x32x48xf32>
    %23 = vector.shape_cast %22 : vector<1x32x48xf32> to vector<32x48xf32>
    %cst_14 = arith.constant dense<0.000000e+00> : vector<32x48xf32>
    %24 = tpu.matmul %21, %23, %cst_14 {dimension_numbers = #tpu.dot_dimension_numbers<[1], [0], [0], [1], [0, 0, 1, 1], [], []>} : vector<32x32xf32>, vector<32x48xf32>, vector<32x48xf32> -> vector<32x48xf32>
    %c31_i32 = arith.constant 31 : i32
    %25 = tpu.dynamic_rotate %21 by %c31_i32 dim 0 : vector<32x32xf32>, i32 -> vector<32x32xf32>
    %c1 = arith.constant 1 : index
    %c0_15 = arith.constant 0 : index
    %c0_16 = arith.constant 0 : index
    %26 = vector.load %arg5[%c1, %c0_15, %c0_16] : memref<4x32x48xf32, #tpu.memory_space<vmem>>, vector<1x32x48xf32>
    %27 = vector.shape_cast %26 : vector<1x32x48xf32> to vector<32x48xf32>
    %cst_17 = arith.constant dense<0.000000e+00> : vector<32x48xf32>
    %28 = tpu.matmul %25, %27, %cst_17 {dimension_numbers = #tpu.dot_dimension_numbers<[1], [0], [0], [1], [0, 0, 1, 1], [], []>} : vector<32x32xf32>, vector<32x48xf32>, vector<32x48xf32> -> vector<32x48xf32>
    %29 = arith.addf %24, %28 : vector<32x48xf32>
    %c30_i32 = arith.constant 30 : i32
    %30 = tpu.dynamic_rotate %21 by %c30_i32 dim 0 : vector<32x32xf32>, i32 -> vector<32x32xf32>
    %c2 = arith.constant 2 : index
    %c0_18 = arith.constant 0 : index
    %c0_19 = arith.constant 0 : index
    %31 = vector.load %arg5[%c2, %c0_18, %c0_19] : memref<4x32x48xf32, #tpu.memory_space<vmem>>, vector<1x32x48xf32>
    %32 = vector.shape_cast %31 : vector<1x32x48xf32> to vector<32x48xf32>
    %cst_20 = arith.constant dense<0.000000e+00> : vector<32x48xf32>
    %33 = tpu.matmul %30, %32, %cst_20 {dimension_numbers = #tpu.dot_dimension_numbers<[1], [0], [0], [1], [0, 0, 1, 1], [], []>} : vector<32x32xf32>, vector<32x48xf32>, vector<32x48xf32> -> vector<32x48xf32>
    %34 = arith.addf %29, %33 : vector<32x48xf32>
    %c29_i32 = arith.constant 29 : i32
    %35 = tpu.dynamic_rotate %21 by %c29_i32 dim 0 : vector<32x32xf32>, i32 -> vector<32x32xf32>
    %c3 = arith.constant 3 : index
    %c0_21 = arith.constant 0 : index
    %c0_22 = arith.constant 0 : index
    %36 = vector.load %arg5[%c3, %c0_21, %c0_22] : memref<4x32x48xf32, #tpu.memory_space<vmem>>, vector<1x32x48xf32>
    %37 = vector.shape_cast %36 : vector<1x32x48xf32> to vector<32x48xf32>
    %cst_23 = arith.constant dense<0.000000e+00> : vector<32x48xf32>
    %38 = tpu.matmul %35, %37, %cst_23 {dimension_numbers = #tpu.dot_dimension_numbers<[1], [0], [0], [1], [0, 0, 1, 1], [], []>} : vector<32x32xf32>, vector<32x48xf32>, vector<32x48xf32> -> vector<32x48xf32>
    %39 = arith.addf %34, %38 : vector<32x48xf32>
    %c0_24 = arith.constant 0 : index
    %c0_25 = arith.constant 0 : index
    %40 = vector.load %arg6[%c0_24, %c0_25] : memref<1x48xf32, #tpu.memory_space<vmem>>, vector<1x48xf32>
    %41 = vector.broadcast %40 : vector<1x48xf32> to vector<32x48xf32>
    %42 = arith.addf %39, %41 : vector<32x48xf32>
    %cst_26 = arith.constant 0.000000e+00 : f32
    %43 = vector.broadcast %cst_26 : f32 to vector<32x48xf32>
    %44 = arith.maximumf %42, %43 : vector<32x48xf32>
    %45 = vector.shape_cast %44 : vector<32x48xf32> to vector<2x16x48xf32>
    %46 = tpu.iota {dimensions = array<i32: 0>} : vector<16x48xi32>
    %c14_i32 = arith.constant 14 : i32
    %47 = vector.broadcast %c14_i32 : i32 to vector<1x16xi32>
    %c12_i32 = arith.constant 12 : i32
    %48 = vector.broadcast %c12_i32 : i32 to vector<1x16xi32>
    %c10_i32 = arith.constant 10 : i32
    %49 = vector.broadcast %c10_i32 : i32 to vector<1x16xi32>
    %50 = tpu.concatenate %47, %48, %49 in 1 : vector<1x16xi32>, vector<1x16xi32>, vector<1x16xi32> -> vector<1x48xi32>
    %51 = vector.broadcast %50 : vector<1x48xi32> to vector<16x48xi32>
    %52 = arith.cmpi slt, %46, %51 : vector<16x48xi32>
    %53 = vector.shape_cast %52 : vector<16x48xi1> to vector<1x16x48xi1>
    %cst_27 = arith.constant 0.000000e+00 : f32
    %54 = vector.shape_cast %53 : vector<1x16x48xi1> to vector<1x16x48xi1>
    %55 = vector.broadcast %54 : vector<1x16x48xi1> to vector<2x16x48xi1>
    %56 = vector.broadcast %cst_27 : f32 to vector<2x16x48xf32>
    %57 = arith.select %55, %45, %56 : vector<2x16x48xi1>, vector<2x16x48xf32>
    %cst_28 = arith.constant dense<0xFF800000> : vector<2x48xf32>
    %58 = vector.multi_reduction <maximumf>, %57, %cst_28 [1] : vector<2x16x48xf32> to vector<2x48xf32>
    %c0_29 = arith.constant 0 : index
    %c0_30 = arith.constant 0 : index
    %59 = vector.load %arg7[%c0_29, %c0_30] : memref<48x8xf32, #tpu.memory_space<vmem>>, vector<48x8xf32>
    %cst_31 = arith.constant dense<0.000000e+00> : vector<2x8xf32>
    %60 = tpu.matmul %58, %59, %cst_31 {dimension_numbers = #tpu.dot_dimension_numbers<[1], [0], [0], [1], [0, 0, 1, 1], [], []>} : vector<2x48xf32>, vector<48x8xf32>, vector<2x8xf32> -> vector<2x8xf32>
    %c0_32 = arith.constant 0 : index
    %c0_33 = arith.constant 0 : index
    %61 = vector.load %arg8[%c0_32, %c0_33] : memref<1x8xf32, #tpu.memory_space<vmem>>, vector<1x8xf32>
    %62 = vector.broadcast %61 : vector<1x8xf32> to vector<2x8xf32>
    %63 = arith.addf %60, %62 : vector<2x8xf32>
    %c0_34 = arith.constant 0 : index
    %c0_35 = arith.constant 0 : index
    %64 = vector.load %arg9[%c0_34, %c0_35] : memref<2x8xf32, #tpu.memory_space<vmem>>, vector<2x8xf32>
    tpu.vector_store %arg9[%c0_34, %c0_35], %63 {strides = array<i32>} : memref<2x8xf32, #tpu.memory_space<vmem>>, vector<2x8xf32>,
    return
  }
}

</mosaic_0001>

<bundles_post_ra>
// kernel: forward.1
= control target key start
LH: loop header
LB: loop body
LE: loop exit
PB: predicated region body
PF: predicated region fallthrough
CT: control target
= control target key end

     0   :  { %v1146_v2 = vmov 0   ;;  %s1423_s0 = inlined_call_operand.vmem [shape: s32[32,1], index: 0, kind: input, shape index: {}]   ;;  %s1424_s1 = inlined_call_operand.vmem [shape: s32[32,1], index: 1, kind: input, shape index: {}]   ;;  %s1425_s2 = inlined_call_operand.vmem [shape: f32[32,32], index: 2, kind: input, shape index: {}]   ;;  %s1426_s3 = inlined_call_operand.vmem [shape: f32[40,32], index: 3, kind: input, shape index: {}]   ;;  %s1427_s4 = inlined_call_operand.vmem [shape: f32[1,32], index: 4, kind: input, shape index: {}]   ;;  %s1428_s5 = inlined_call_operand.vmem [shape: f32[4,32,48], index: 5, kind: input, shape index: {}]   ;;  %s1429_s6 = inlined_call_operand.vmem [shape: f32[1,48], index: 6, kind: input, shape index: {}]   ;;  %s1430_s7 = inlined_call_operand.vmem [shape: f32[48,8], index: 7, kind: input, shape index: {}]   ;;  %s1431_s8 = inlined_call_operand.vmem [shape: f32[1,8], index: 8, kind: input, shape index: {}]   ;;  %s1432_s9 = inlined_call_operand.hbm [shape: f32[2,8], index: 9, kind: output, shape index: {}]  }
   0x1   :  { %v36_v0 = vld [vmem:[%s1423_s0 + $0x8] sm:$0xff]  ;;  %v35_v1 = vld [vmem:[%s1423_s0] sm:$0xff]  ;;  %1123 = vset.pattern.permute.xlu1 %v1146_v2  ;;  %1122 = vset.pattern.permute.xlu0 %v1146_v2  ;;  %v94_v4 = vld [vmem:[%s1425_s2 + $0x18] sm:$0xff] }
   0x2   :  { %43 = vperm.xlu1 %1123, %v36_v0   ;;  %40 = vperm.xlu0 %1122, %v35_v1   ;;  %v64_v3 = vld [vmem:[%s1424_s1 + $0x8] sm:$0xff]  ;;  %v63_v5 = vld [vmem:[%s1424_s1] sm:$0xff]  ;;  %v93_v7 = vld [vmem:[%s1425_s2 + $0x10] sm:$0xff] }
   0x3   :  { %1032 = vmatprep.subr.mxu1 %v94_v4  ;;  %v99_v6 = vld [vmem:[%s1426_s3 + $0x20] sm:$0xff]  ;;  %v98_v8 = vld [vmem:[%s1426_s3 + $0x18] sm:$0xff]  ;;  %v92_v9 = vld [vmem:[%s1425_s2 + $0x8] sm:$0xff] }
   0x4   :  { %1033 = vmatpush3.msra.mxu1 %v94_v4  ;;  %1016 = vmatprep.subr.mxu0 %v99_v6 }
   0x5   :  { %1034 = vmatprep.subr.mxu1 %v93_v7  ;;  %1017 = vmatpush3.msra.mxu0 %v99_v6 }
   0x6   :  { %14 = vsyncpa [#allocation3], 0  ;;  %71 = vperm.xlu1 %1123, %v64_v3   ;;  %68 = vperm.xlu0 %1122, %v63_v5   ;;  %v97_v10 = vld [vmem:[%s1426_s3 + $0x10] sm:$0xff]  ;;  %v91_v13 = vld [vmem:[%s1425_s2] sm:$0xff]  ;;  %v33_v18 = vlaneseq  ;;  %vm198_vm0 = vcmask 261120   ;;  %v1147_v22 = vmov 0.0  }
   0x7   :  { %v65_v11 = vld [vmem:[%s1424_s1 + $0x10] sm:$0xff]  ;;  %1035 = vmatpush3.msra.mxu1 %v93_v7  ;;  %1018 = vmatprep.subr.mxu0 %v98_v8  ;;  %v96_v14 = vld [vmem:[%s1426_s3 + $0x8] sm:$0xff]  ;;  %v66_v15 = vld [vmem:[%s1424_s1 + $0x18] sm:$0xff]  ;;  %vm100_vm3 = vcmask 326656   ;;  %vm1148_vm13 = vmmov 0   ;;  %vm771_vm14 = vcmask 130048  }
   0x8   :  { %v37_v12 = vld [vmem:[%s1423_s0 + $0x10] sm:$0xff]  ;;  %1036 = vmatprep.subr.mxu1 %v92_v9  ;;  %1019 = vmatpush3.msra.mxu0 %v98_v8  ;;  %v38_v16 = vld [vmem:[%s1423_s0 + $0x18] sm:$0xff]  ;;  %v95_v17 = vld [vmem:[%s1426_s3] sm:$0xff]  ;;  %v34_v19 = vand.u32 127, %v33_v18  ;;  %v1303_v55 = vshrl.u32 %v33_v18, 7  ;;  %s1150_s18 = smov [#allocation2]  }
   0x9   :  { %1037 = vmatpush3.msra.mxu1 %v92_v9  ;;  %1020 = vmatprep.subr.mxu0 %v97_v10  ;;  %v314_v37 = vld [vmem:[%s1428_s5 + $0x18] sm:$0xff]  ;;  %v313_v38 = vld [vmem:[%s1428_s5 + $0x10] sm:$0xff]  ;;  %v312_v39 = vld [vmem:[%s1428_s5 + $0x8] sm:$0xff] }
   0xa   :  { %74 = vperm.xlu1 %1123, %v65_v11   ;;  %46 = vperm.xlu0 %1122, %v37_v12   ;;  %v311_v40 = vld [vmem:[%s1428_s5] sm:$0xff]  ;;  %v932_v41 = vld [vmem:[%s1428_s5 + $0x38] sm:$0xff]  ;;  %v931_v42 = vld [vmem:[%s1428_s5 + $0x30] sm:$0xff]  ;;  %vm321_vm10 = vcmp.lt.s32.totalorder %v1303_v55, 7  ;;  %vm644_vm11 = vcmp.lt.s32.totalorder %v1303_v55, 5  ;;  %vm529_vm12 = vcmp.lt.s32.totalorder %v1303_v55, 6 }
   0xb   :  { %1038 = vmatprep.subr.mxu1 %v91_v13  ;;  %1021 = vmatpush3.msra.mxu0 %v97_v10  ;;  %v952_v43 = vld [vmem:[%s1428_s5 + $0x78] sm:$0xff]  ;;  %v930_v44 = vld [vmem:[%s1428_s5 + $0x28] sm:$0xff]  ;;  %v929_v45 = vld [vmem:[%s1428_s5 + $0x20] sm:$0xff] }
   0xc   :  { %1039 = vmatpush3.msra.mxu1 %v91_v13  ;;  %1022 = vmatprep.subr.mxu0 %v96_v14  ;;  %v944_v46 = vld [vmem:[%s1428_s5 + $0x58] sm:$0xff]  ;;  %v928_v49 = vld [vmem:[%s1427_s4] ss:$0 sm:$0xff]  ;;  %v951_v2 = vld [vmem:[%s1428_s5 + $0x70] sm:$0xff]  ;;  %s904_s4 = sshll.u32 %s1150_s18, 4  ;;  %s905_s4 = int_to_ptr.vmem [resolvable:$true] %s904_s4 }
   0xd   :  { %1023 = vmatpush3.msra.mxu0 %v96_v14  ;;  %1046 = vmatprep.subr.mxu1 %v932_v41  ;;  %v950_v6 = vld [vmem:[%s1428_s5 + $0x68] sm:$0xff]  ;;  %v949_v10 = vld [vmem:[%s1428_s5 + $0x60] sm:$0xff]  ;;  %s1124_s19 = scalar_lea.vmem %s905_s4, 32  ;;  %p1129_p1 = scmp.lt.s32.totalorder %s905_s4, %s905_s4 }
   0xe   :  { %77 = vperm.xlu1 %1123, %v66_v15   ;;  %49 = vperm.xlu0 %1122, %v38_v16   ;;  %p1125_p0 = scmp.ne.s32.totalorder %s905_s4, %s1124_s19  ;;  %p1130_p2 = scmp.lt.s32.totalorder %s1124_s19, %s1124_s19 }
   0xf   :  { %1024 = vmatprep.subr.mxu0 %v95_v17 }
  0x10   :  { %1025 = vmatpush3.msra.mxu0 %v95_v17  ;;  %p1131_p3 = por %p1130_p2, %p1129_p1 }
  0x11   :  { %1060 = vmatprep.subr.mxu0 %v314_v37 }
  0x12   :  { %p1132_p4 = pnand %p1131_p3, %p1125_p0 }
  0x7d   :  { %v44_v20 = vpop.permute.xlu1 %43  ;;  %v41_v21 = vpop.permute.xlu0 %40 }
  0x7e   :  { %vm52_vm1 = vcmp.eq.s32.totalorder %v34_v19, %v44_v20  ;;  %vm51_vm2 = vcmp.eq.s32.totalorder %v34_v19, %v41_v21 }
  0x7f   :  { %v913_v23 = vsel %vm52_vm1, 1.0, %v1147_v22  ;;  %v912_v24 = vsel %vm51_vm2, 1.0, %v1147_v22  ;;  %vm822_vm2 = vcmask 1041409  }
  0x80   :  { %1040 = vmatprep.mubr.msk.f32.mxu1 %vm198_vm0, %v912_v24  ;;  %v942_v24 = vld [vmem:[%s1428_s5 + $0x48] sm:$0xff] }
  0x81   :  { %v72_v25 = vpop.permute.xlu1 %71  ;;  %v69_v26 = vpop.permute.xlu0 %68  ;;  %1041 = vmatmul.mubr.msk.f32.vlgmr.msra.gmra.mxu1 %vm198_vm0, %v913_v23 }
  0x82   :  { %vm80_vm4 = vcmp.eq.s32.totalorder %v34_v19, %v72_v25  ;;  %vm79_vm5 = vcmp.eq.s32.totalorder %v34_v19, %v69_v26  ;;  %1047 = vmatpush3.msra.mxu1 %v932_v41  ;;  %v807_v41 = vld [vmem:[%s1430_s7] sm:$0xff] }
  0x83   :  { %v917_v27 = vsel %vm80_vm4, 1.0, %v1147_v22  ;;  %v916_v28 = vsel %vm79_vm5, 1.0, %v1147_v22  ;;  %1048 = vmatprep.subr.mxu1 %v931_v42 }
  0x84   :  { %1026 = vmatprep.mubr.msk.f32.mxu0 %vm100_vm3, %v916_v28  ;;  %1049 = vmatpush3.msra.mxu1 %v931_v42 }
  0x85   :  { %v75_v29 = vpop.permute.xlu1 %74  ;;  %v47_v30 = vpop.permute.xlu0 %46  ;;  %1027 = vmatmul.mubr.msk.f32.vlgmr.msra.gmra.mxu0 %vm100_vm3, %v917_v27  ;;  %1050 = vmatprep.subr.mxu1 %v930_v44 }
  0x86   :  { %vm81_vm6 = vcmp.eq.s32.totalorder %v34_v19, %v75_v29  ;;  %vm53_vm7 = vcmp.eq.s32.totalorder %v34_v19, %v47_v30  ;;  %1061 = vmatpush3.msra.mxu0 %v314_v37  ;;  %1051 = vmatpush3.msra.mxu1 %v930_v44  ;;  %v941_v29 = vld [vmem:[%s1428_s5 + $0x40] sm:$0xff] }
  0x87   :  { %v918_v31 = vsel %vm81_vm6, 1.0, %v1147_v22  ;;  %v914_v32 = vsel %vm53_vm7, 1.0, %v1147_v22  ;;  %1062 = vmatprep.subr.mxu0 %v313_v38  ;;  %1052 = vmatprep.subr.mxu1 %v929_v45  ;;  %v811_v37 = vld [vmem:[%s1430_s7 + $0x20] sm:$0xff] }
  0x88   :  { %1029 = vmatprep.mubr.msk.f32.mxu0 %vm100_vm3, %v918_v31  ;;  %1043 = vmatprep.mubr.msk.f32.mxu1 %vm198_vm0, %v914_v32 }
  0x89   :  { %v78_v33 = vpop.permute.xlu1 %77  ;;  %v50_v34 = vpop.permute.xlu0 %49  ;;  %1063 = vmatpush3.msra.mxu0 %v313_v38  ;;  %1053 = vmatpush3.msra.mxu1 %v929_v45  ;;  %v810_v38 = vld [vmem:[%s1430_s7 + $0x18] sm:$0xff] }
  0x8a   :  { %vm82_vm8 = vcmp.eq.s32.totalorder %v34_v19, %v78_v33  ;;  %vm54_vm9 = vcmp.eq.s32.totalorder %v34_v19, %v50_v34  ;;  %1064 = vmatprep.subr.mxu0 %v312_v39  ;;  %1074 = vmatprep.subr.mxu1 %v944_v46  ;;  %v943_v19 = vld [vmem:[%s1428_s5 + $0x50] sm:$0xff] }
  0x8b   :  { %v919_v35 = vsel %vm82_vm8, 1.0, %v1147_v22  ;;  %v915_v36 = vsel %vm54_vm9, 1.0, %v1147_v22  ;;  %1065 = vmatpush3.msra.mxu0 %v312_v39  ;;  %v809_v39 = vld [vmem:[%s1430_s7 + $0x10] sm:$0xff] }
  0x8c   :  { %1030 = vmatmul.mubr.msk.f32.gmra.mxu0 %vm100_vm3, %v919_v35  ;;  %1044 = vmatmul.mubr.msk.f32.gmra.mxu1 %vm198_vm0, %v915_v36  ;;  %v812_v36 = vld [vmem:[%s1430_s7 + $0x28] sm:$0xff]  ;;  %vm896_vm3 = vcmask 58368  }
  0x8d   :  { %1066 = vmatprep.subr.mxu0 %v311_v40 }
  0x8e   :  { %1067 = vmatpush3.msra.mxu0 %v311_v40  ;;  %v808_v40 = vld [vmem:[%s1430_s7 + $0x8] sm:$0xff] }
  0x8f   :  { %1088 = vmatprep.subr.mxu0 %v952_v43 }
 0x141   :  { %v1042_v47 = vpop.f32.mrf.mxu1 }
 0x143   :  { %v277_v51 = vpop.f32.mrf.mxu1 }
 0x145   :  { %v1028_v48 = vpop.f32.mrf.mxu0 }
 0x146   :  { %v283_v50 = vadd.f32 %v1042_v47, %v1028_v48 }
 0x147   :  { %v179_v52 = vpop.f32.mrf.mxu0 }
 0x148   :  { %v304_v53 = vadd.f32 %v928_v49, %v283_v50  ;;  %v278_v54 = vadd.f32 %v277_v51, %v179_v52  ;;  %v1149_v50 = vmov 12  }
 0x149   :  { %v772_v51 = vsel %vm771_vm14, 14, %v1149_v50 }
 0x14a   :  { %v1305_v56 = vmax.f32 %v304_v53, 0.0  ;;  %v303_v57 = vadd.f32 %v928_v49, %v278_v54  ;;  %v776_v53 = vsub.s32 0, %v1303_v55 }
 0x14c   :  { %v1307_v58 = vmax.f32 %v303_v57, 0.0  ;;  %v1031_v59 = vpop.f32.mrf.mxu0  ;;  %v1045_v60 = vpop.f32.mrf.mxu1  ;;  %v316_v1 = vrot.slane %v1305_v56, 1  ;;  %v641_v12 = vrot.slane %v1305_v56, 3  ;;  %v526_v26 = vrot.slane %v1305_v56, 2 }
 0x14d   :  { %v293_v61 = vadd.f32 %v1045_v60, %v1031_v59  ;;  %v957_v60 = vld [vmem:[%s1429_s6] ss:$0 sm:$0xff] }
 0x14e   :  { %v189_v62 = vpop.f32.mrf.mxu0  ;;  %v287_v63 = vpop.f32.mrf.mxu1  ;;  %1068 = vmatprep.mubr.msk.f32.mxu0 %vm198_vm0, %v1307_v58  ;;  %v315_v0 = vrot.slane %v1307_v58, 1  ;;  %v640_v9 = vrot.slane %v1307_v58, 3  ;;  %v525_v21 = vrot.slane %v1307_v58, 2 }
 0x14f   :  { %v306_v3 = vadd.f32 %v928_v49, %v293_v61  ;;  %v288_v4 = vadd.f32 %v287_v63, %v189_v62  ;;  %1069 = vmatmul.mubr.msk.f32.vlgmr.msra.gmra.mxu0 %vm198_vm0, %v1305_v56  ;;  %v773_v56 = vsel %vm198_vm0, %v772_v51, 10  ;;  %v770_v61 = vadd.s32 8, %v1303_v55 }
 0x150   :  { %v324_v5 = vsel %vm321_vm10, %v315_v0, %v316_v1  ;;  %1089 = vmatpush3.msra.mxu0 %v952_v43  ;;  %v647_v16 = vsel %vm644_vm11, %v640_v9, %v641_v12  ;;  %v532_v30 = vsel %vm529_vm12, %v525_v21, %v526_v26  ;;  %v777_v62 = vrot.slane %v773_v56, %v776_v53 }
 0x151   :  { %v310_v7 = vmax.f32 %v306_v3, 0.0  ;;  %v305_v8 = vadd.f32 %v928_v49, %v288_v4  ;;  %1054 = vmatprep.mubr.msk.f32.mxu1 %vm198_vm0, %v324_v5  ;;  %1090 = vmatprep.subr.mxu0 %v951_v2 }
 0x152   :  { %1091 = vmatpush3.msra.mxu0 %v951_v2  ;;  %vm779_vm15 = vcmp.lt.s32.totalorder %v770_v61, %v777_v62  ;;  %vm778_vm1 = vcmp.lt.s32.totalorder %v1303_v55, %v777_v62 }
 0x153   :  { %v309_v11 = vmax.f32 %v305_v8, 0.0  ;;  %1092 = vmatprep.subr.mxu0 %v950_v6  ;;  %v318_v15 = vrot.slane %v310_v7, 1  ;;  %v643_v20 = vrot.slane %v310_v7, 3  ;;  %v528_v32 = vrot.slane %v310_v7, 2 }
 0x154   :  { %1093 = vmatpush3.msra.mxu0 %v950_v6 }
 0x155   :  { %v317_v13 = vrot.slane %v309_v11, 1  ;;  %v642_v14 = vrot.slane %v309_v11, 3  ;;  %1071 = vmatprep.mubr.msk.f32.mxu0 %vm198_vm0, %v309_v11  ;;  %1094 = vmatprep.subr.mxu0 %v949_v10  ;;  %v527_v27 = vrot.slane %v309_v11, 2  ;;  %v325_v28 = vsel %vm321_vm10, %v318_v15, %v315_v0 }
 0x156   :  { %1072 = vmatmul.mubr.msk.f32.gmra.mxu0 %vm198_vm0, %v310_v7  ;;  %v648_v31 = vsel %vm644_vm11, %v643_v20, %v640_v9  ;;  %v533_v35 = vsel %vm529_vm12, %v528_v32, %v525_v21 }
 0x157   :  { %1096 = vmatprep.mubr.msk.f32.mxu0 %vm198_vm0, %v647_v16  ;;  %v323_v17 = vsel %vm321_vm10, %v316_v1, %v317_v13  ;;  %v322_v18 = vsel %vm321_vm10, %v317_v13, %v318_v15  ;;  %1095 = vmatpush3.msra.mxu0 %v949_v10  ;;  %v646_v23 = vsel %vm644_vm11, %v641_v12, %v642_v14 }
 0x158   :  { %1055 = vmatmul.mubr.msk.f32.vlgmr.msra.gmra.mxu1 %vm198_vm0, %v323_v17  ;;  %v645_v25 = vsel %vm644_vm11, %v642_v14, %v643_v20  ;;  %v531_v33 = vsel %vm529_vm12, %v526_v26, %v527_v27  ;;  %v530_v34 = vsel %vm529_vm12, %v527_v27, %v528_v32 }
 0x159   :  { %1075 = vmatpush3.msra.mxu1 %v944_v46  ;;  %1057 = vmatprep.mubr.msk.f32.mxu1 %vm198_vm0, %v322_v18 }
 0x15a   :  { %1076 = vmatprep.subr.mxu1 %v943_v19  ;;  %1097 = vmatmul.mubr.msk.f32.vlgmr.msra.gmra.mxu0 %vm198_vm0, %v646_v23 }
 0x15b   :  { %1077 = vmatpush3.msra.mxu1 %v943_v19  ;;  %1099 = vmatprep.mubr.msk.f32.mxu0 %vm198_vm0, %v645_v25 }
 0x15c   :  { %1078 = vmatprep.subr.mxu1 %v942_v24  ;;  %1058 = vmatmul.mubr.msk.f32.gmra.mxu1 %vm198_vm0, %v325_v28 }
 0x15d   :  { %1079 = vmatpush3.msra.mxu1 %v942_v24  ;;  %1082 = vmatprep.mubr.msk.f32.mxu1 %vm198_vm0, %v532_v30 }
 0x15e   :  { %1080 = vmatprep.subr.mxu1 %v941_v29  ;;  %1100 = vmatmul.mubr.msk.f32.gmra.mxu0 %vm198_vm0, %v648_v31 }
 0x15f   :  { %1081 = vmatpush3.msra.mxu1 %v941_v29 }
 0x160   :  { %1083 = vmatmul.mubr.msk.f32.vlgmr.msra.gmra.mxu1 %vm198_vm0, %v531_v33  ;;  %1102 = vmatprep.subr.mxu1 %v1147_v22 }
 0x161   :  { %1085 = vmatprep.mubr.msk.f32.mxu1 %vm198_vm0, %v530_v34  ;;  %1103 = vmatpush3.msra.mxu1 %v812_v36 }
 0x162   :  { %1104 = vmatprep.subr.mxu1 %v1147_v22 }
 0x163   :  { %1105 = vmatpush3.msra.mxu1 %v811_v37 }
 0x164   :  { %1086 = vmatmul.mubr.msk.f32.gmra.mxu1 %vm198_vm0, %v533_v35  ;;  %1106 = vmatprep.subr.mxu1 %v1147_v22  ;;  %vm788_vm0 = vcmask 392192  }
 0x165   :  { %1107 = vmatpush3.msra.mxu1 %v810_v38  ;;  %1114 = vmatprep.mubr.msk.f32.mxu1 %vm1148_vm13, %v1147_v22 }
 0x166   :  { %1108 = vmatprep.subr.mxu1 %v1147_v22 }
 0x167   :  { %1109 = vmatpush3.msra.mxu1 %v809_v39 }
 0x168   :  { %1110 = vmatprep.subr.mxu1 %v1147_v22 }
 0x169   :  { %1111 = vmatpush3.msra.mxu1 %v808_v40 }
 0x16a   :  { %1112 = vmatprep.subr.mxu1 %v1147_v22 }
 0x16b   :  { %1113 = vmatpush3.msra.mxu1 %v807_v41 }
 0x20f   :  { %v1070_v42 = vpop.f32.mrf.mxu0 }
 0x211   :  { %v506_v43 = vpop.f32.mrf.mxu0 }
 0x216   :  { %v1073_v44 = vpop.f32.mrf.mxu0 }
 0x218   :  { %v1056_v45 = vpop.f32.mrf.mxu1  ;;  %v516_v46 = vpop.f32.mrf.mxu0 }
 0x219   :  { %v512_v54 = vadd.f32 %v1070_v42, %v1056_v45 }
 0x21a   :  { %v409_v47 = vpop.f32.mrf.mxu1  ;;  %v1098_v48 = vpop.f32.mrf.mxu0 }
 0x21b   :  { %v507_v58 = vadd.f32 %v506_v43, %v409_v47 }
 0x21c   :  { %v1059_v49 = vpop.f32.mrf.mxu1  ;;  %v732_v57 = vpop.f32.mrf.mxu0 }
 0x21d   :  { %v522_v0 = vadd.f32 %v1073_v44, %v1059_v49  ;;  %v958_v44 = vld [vmem:[%s1431_s8] ss:$0 sm:$0xff] }
 0x21e   :  { %v419_v52 = vpop.f32.mrf.mxu1  ;;  %v1101_v3 = vpop.f32.mrf.mxu0 }
 0x21f   :  { %v517_v5 = vadd.f32 %v516_v46, %v419_v52 }
 0x220   :  { %v1084_v22 = vpop.f32.mrf.mxu1  ;;  %v742_v14 = vpop.f32.mrf.mxu0 }
 0x221   :  { %v637_v59 = vadd.f32 %v1084_v22, %v512_v54 }
 0x222   :  { %v617_v63 = vpop.f32.mrf.mxu1 }
 0x223   :  { %v752_v1 = vadd.f32 %v1098_v48, %v637_v59  ;;  %v636_v2 = vadd.f32 %v617_v63, %v507_v58 }
 0x224   :  { %v1087_v4 = vpop.f32.mrf.mxu1 }
 0x225   :  { %v763_v6 = vadd.f32 %v957_v60, %v752_v1  ;;  %v751_v7 = vadd.f32 %v732_v57, %v636_v2  ;;  %v639_v8 = vadd.f32 %v1087_v4, %v522_v0 }
 0x226   :  { %v627_v9 = vpop.f32.mrf.mxu1 }
 0x227   :  { %v767_v10 = vmax.f32 %v763_v6, 0.0  ;;  %v762_v11 = vadd.f32 %v957_v60, %v751_v7  ;;  %v754_v12 = vadd.f32 %v1101_v3, %v639_v8  ;;  %v638_v13 = vadd.f32 %v627_v9, %v517_v5 }
 0x229   :  { %v785_v15 = vsel %vm779_vm15, %v767_v10, 0.0  ;;  %v766_v16 = vmax.f32 %v762_v11, 0.0  ;;  %v765_v17 = vadd.f32 %v957_v60, %v754_v12  ;;  %v753_v18 = vadd.f32 %v742_v14, %v638_v13 }
 0x22a   :  { %v790_v23 = vsel %vm788_vm0, %v785_v15, -inf }
 0x22b   :  { %v784_v19 = vsel %vm778_vm1, %v766_v16, 0.0  ;;  %v769_v20 = vmax.f32 %v765_v17, 0.0  ;;  %v764_v21 = vadd.f32 %v957_v60, %v753_v18 }
 0x22c   :  { %v789_v24 = vsel %vm788_vm0, %v784_v19, -inf }
 0x22d   :  { %v791_v25 = vmax.f32 %v789_v24, %v790_v23  ;;  %v787_v26 = vsel %vm779_vm15, %v769_v20, 0.0  ;;  %v768_v27 = vmax.f32 %v764_v21, 0.0 }
 0x22e   :  { %v799_v55 = vsel %vm788_vm0, %v787_v26, -inf }
 0x22f   :  { %v792_v28 = vrot.slane %v791_v25, 4  ;;  %v786_v29 = vsel %vm778_vm1, %v768_v27, 0.0 }
 0x230   :  { %v798_v30 = vsel %vm788_vm0, %v786_v29, -inf }
 0x231   :  { %v793_v31 = vmax.f32 %v791_v25, %v792_v28  ;;  %v800_v32 = vmax.f32 %v798_v30, %v799_v55 }
 0x233   :  { %v794_v33 = vrot.slane %v793_v31, 2  ;;  %v801_v34 = vrot.slane %v800_v32, 4 }
 0x235   :  { %v795_v35 = vmax.f32 %v793_v31, %v794_v33  ;;  %v802_v36 = vmax.f32 %v800_v32, %v801_v34 }
 0x237   :  { %v803_v37 = vrot.slane %v802_v36, 2  ;;  %v796_v39 = vrot.slane %v795_v35, 1 }
 0x239   :  { %v804_v38 = vmax.f32 %v802_v36, %v803_v37  ;;  %v797_v41 = vmax.f32 %v795_v35, %v796_v39 }
 0x23b   :  { %v805_v40 = vrot.slane %v804_v38, 1 }
 0x23d   :  { %v806_v42 = vmax.f32 %v804_v38, %v805_v40 }
 0x23f   :  { %v823_v43 = vsel %vm822_vm2, %v806_v42, %v797_v41 }
 0x240   :  { %1115 = vmatmul.mubr.msk.f32.vlgmr.msra.gmra.mxu1 %vm788_vm0, %v823_v43 }
 0x300   :  { %v892_v45 = vpop.f32.mrf.mxu1 }
 0x301   :  { %v893_v46 = vadd.f32 %v958_v44, %v892_v45 }
 0x302   :  { %v1116_v47 = vpop.f32.mrf.mxu1 }
 0x303   :  { %897 = vst.msk [vmem:[#allocation2] sm:$0x3] %vm896_vm3, %v893_v46 }
 0x304   :  { %1135 = shalt.err (!%p1132_p4)
}
 0x305   :  { %907 = dma.vmem_to_hbm [thread:$0]  %s905_s4, 32, %s1432_s9, [#allocation3]  }
 0x306   :  { %1144 = dma.done.wait [#allocation3], 32  }
 0x307   :  { %1145 = vsyncadd [#allocation3], 4294967264 }
 0x308   :  { %911 = vsyncpa [#allocation3], 1 }

</bundles_post_ra>
